<compile_context>
chip_gen: v5e
topology: v5e:2x2
jax: 0.10.0
libtpu: 0.0.40
codegen_flags: <defaults>
</compile_context>

<pallas_src>
import jax
import jax.numpy as jnp
from jax.experimental import pallas as pl
from jax.experimental.pallas import tpu as pltpu


# --------------------------------------------------------------------------
# Fused kernel: out = A @ relu(A @ (X @ W1) + b1) @ W2 ... i.e. two GCN layers
# --------------------------------------------------------------------------
def _gnn_fused_kernel(a_ref, x_ref, w1_ref, b1_ref, w2_ref, b2_ref, o_ref, h_ref):
    # ---- Layer 1: H = relu(A_hat @ (X @ W1) + b1) -------------------------
    # Feature transform then neighborhood aggregation, both on the MXU with
    # bf16 inputs and f32 accumulation.
    xw = jnp.dot(x_ref[...], w1_ref[...], preferred_element_type=jnp.float32)
    agg1 = jnp.dot(a_ref[...], xw.astype(jnp.bfloat16),
                   preferred_element_type=jnp.float32)
    h = jnp.maximum(agg1 + b1_ref[...], 0.0)          # f32 epilogue (v5e-safe)
    h_ref[...] = h.astype(jnp.bfloat16)                # hidden stays in VMEM

    # ---- Layer 2: out = A_hat @ (H @ W2) + b2 ------------------------------
    hw = jnp.dot(h_ref[...], w2_ref[...], preferred_element_type=jnp.float32)
    agg2 = jnp.dot(a_ref[...], hw.astype(jnp.bfloat16),
                   preferred_element_type=jnp.float32)
    o_ref[...] = (agg2 + b2_ref[...]).astype(o_ref.dtype)


# --------------------------------------------------------------------------
# Plain-JAX glue
# --------------------------------------------------------------------------
def _round_up(x, m):
    return ((x + m - 1) // m) * m


def _pad2d(x, rows, cols):
    r, c = x.shape
    return jnp.pad(x, ((0, rows - r), (0, cols - c)))


def build_normalized_adjacency(edge_index, num_nodes):
    """Dense D^{-1/2} (A + I_remaining) D^{-1/2} from a (2, E) int edge_index.

    Uses a one-hot matmul (MXU-friendly, no HLO scatter).  Duplicate edges sum
    (matching torch_geometric message accumulation); self-loops are added only
    for nodes without an existing one (add_remaining_self_loops).
    """
    src, dst = edge_index[0], edge_index[1]
    oh_dst = jax.nn.one_hot(dst, num_nodes, dtype=jnp.float32)   # (E, N)
    oh_src = jax.nn.one_hot(src, num_nodes, dtype=jnp.float32)   # (E, N)
    # message flows src -> dst : row = dst, col = src (matches GCNConv scatter)
    a = jnp.dot(oh_dst.T, oh_src)                                # sums duplicates
    diag = jnp.diagonal(a)
    a = a + jnp.diag(jnp.where(diag > 0.0, 0.0, 1.0))            # remaining self-loops
    deg = jnp.sum(a, axis=1)
    d_inv_sqrt = jnp.where(deg > 0.0, 1.0 / jnp.sqrt(deg), 0.0)
    return d_inv_sqrt[:, None] * a * d_inv_sqrt[None, :]


def gnn_forward(x, edge_index, params):
    """GNN.forward: GCNConv -> ReLU -> GCNConv, fused into one Pallas kernel."""
    n, f_in = x.shape
    (w1, b1), (w2, b2) = params
    hidden = w1.shape[1]
    n_cls = w2.shape[1]

    a_hat = build_normalized_adjacency(edge_index, n)

    # Lane-dense padding: every matmul dim becomes a multiple of 128.
    n_pad = _round_up(n, 128)
    f_pad = _round_up(f_in, 128)
    h_pad = _round_up(hidden, 128)
    c_pad = _round_up(n_cls, 128)

    a_p = _pad2d(a_hat, n_pad, n_pad).astype(jnp.bfloat16)
    x_p = _pad2d(x, n_pad, f_pad).astype(jnp.bfloat16)
    w1_p = _pad2d(w1, f_pad, h_pad).astype(jnp.bfloat16)
    b1_p = _pad2d(b1.reshape(1, -1), 1, h_pad).astype(jnp.float32)
    w2_p = _pad2d(w2, h_pad, c_pad).astype(jnp.bfloat16)
    b2_p = _pad2d(b2.reshape(1, -1), 1, c_pad).astype(jnp.float32)

    vmem_spec = pl.BlockSpec(memory_space=pltpu.MemorySpace.VMEM)
    out_p = pl.pallas_call(
        _gnn_fused_kernel,
        out_shape=jax.ShapeDtypeStruct((n_pad, c_pad), jnp.float32),
        in_specs=[vmem_spec] * 6,
        out_specs=vmem_spec,
        scratch_shapes=[pltpu.VMEM((n_pad, h_pad), jnp.bfloat16)],
    )(a_p, x_p, w1_p, b1_p, w2_p, b2_p)

    return out_p[:n, :n_cls]


# --------------------------------------------------------------------------
# Pure-JAX references
# --------------------------------------------------------------------------
def gnn_forward_f32_ref(x, edge_index, params):
    """Full-precision reference (true module semantics)."""
    a_hat = build_normalized_adjacency(edge_index, x.shape[0])
    (w1, b1), (w2, b2) = params
    h = jnp.maximum(a_hat @ (x @ w1) + b1, 0.0)
    return a_hat @ (h @ w2) + b2


def gnn_forward_bf16_ref(x, edge_index, params):
    """Reference that mimics the kernel's bf16-MXU / f32-accumulate numerics."""
    a_hat = build_normalized_adjacency(edge_index, x.shape[0]).astype(jnp.bfloat16)
    (w1, b1), (w2, b2) = params
    xw = jnp.dot(x.astype(jnp.bfloat16), w1.astype(jnp.bfloat16),
                 preferred_element_type=jnp.float32)
    h = jnp.maximum(
        jnp.dot(a_hat, xw.astype(jnp.bfloat16), preferred_element_type=jnp.float32)
        + b1, 0.0)
    hw = jnp.dot(h.astype(jnp.bfloat16), w2.astype(jnp.bfloat16),
                 preferred_element_type=jnp.float32)
    return (jnp.dot(a_hat, hw.astype(jnp.bfloat16),
                    preferred_element_type=jnp.float32) + b2)


if __name__ == "__main__":
    key = jax.random.PRNGKey(0)
    k_x, k_e, k_w1, k_w2 = jax.random.split(key, 4)

    num_nodes = 16
    num_edges = 48
    in_features = 16
    hidden = 32
    num_classes = 8

    # Node features and random directed edge list (2, E).
    x = jax.random.normal(k_x, (num_nodes, in_features), dtype=jnp.float32)
    edge_index = jax.random.randint(k_e, (2, num_edges), 0, num_nodes, dtype=jnp.int32)

    # Glorot-ish parameter init, zero bias — shapes follow
    # GCNConv(in_features, hidden) and GCNConv(hidden, num_classes).
    w1 = jax.random.normal(k_w1, (in_features, hidden), dtype=jnp.float32) * (
        1.0 / jnp.sqrt(in_features))
    b1 = jnp.zeros((1, hidden), dtype=jnp.float32)
    w2 = jax.random.normal(k_w2, (hidden, num_classes), dtype=jnp.float32) * (
        1.0 / jnp.sqrt(hidden))
    b2 = jnp.zeros((1, num_classes), dtype=jnp.float32)
    params = ((w1, b1), (w2, b2))

    fwd = jax.jit(gnn_forward)
    out = jax.block_until_ready(fwd(x, edge_index, params))
    assert out.shape == (num_nodes, num_classes)

    # Tight check against a reference with identical (bf16-in / f32-acc) numerics.
    ref_bf16 = gnn_forward_bf16_ref(x, edge_index, params)
    assert jnp.allclose(out, ref_bf16, atol=2e-3, rtol=2e-3)

    # Looser check against the full-f32 semantics of the original module.
    ref_f32 = gnn_forward_f32_ref(x, edge_index, params)
    assert jnp.allclose(out, ref_f32, atol=5e-2, rtol=5e-2)

    print("KERNEL_OK")
</pallas_src>

<mosaic_0001>
module attributes {stable_mosaic.version = 11 : i64} {
  func.func @_gnn_fused_kernel(%arg0: memref<128x128xbf16, #tpu.memory_space<vmem>>, %arg1: memref<128x128xbf16, #tpu.memory_space<vmem>>, %arg2: memref<128x128xbf16, #tpu.memory_space<vmem>>, %arg3: memref<1x128xf32, #tpu.memory_space<vmem>>, %arg4: memref<128x128xbf16, #tpu.memory_space<vmem>>, %arg5: memref<1x128xf32, #tpu.memory_space<vmem>>, %arg6: memref<128x128xf32, #tpu.memory_space<vmem>>, %arg7: memref<128x128xbf16, #tpu.memory_space<vmem>>) attributes {dimension_semantics = [], scalar_prefetch = 0 : i64, scratch_operands = 1 : i64, tpu.core_type = #tpu.core_type<tc>} {
    %c0 = arith.constant 0 : index
    %c0_0 = arith.constant 0 : index
    %0 = vector.load %arg1[%c0, %c0_0] : memref<128x128xbf16, #tpu.memory_space<vmem>>, vector<128x128xbf16>
    %c0_1 = arith.constant 0 : index
    %c0_2 = arith.constant 0 : index
    %1 = vector.load %arg2[%c0_1, %c0_2] : memref<128x128xbf16, #tpu.memory_space<vmem>>, vector<128x128xbf16>
    %cst = arith.constant dense<0.000000e+00> : vector<128x128xf32>
    %2 = tpu.matmul %0, %1, %cst {dimension_numbers = #tpu.dot_dimension_numbers<[1], [0], [0], [1], [0, 0, 1, 1], [], []>} : vector<128x128xbf16>, vector<128x128xbf16>, vector<128x128xf32> -> vector<128x128xf32>
    %c0_3 = arith.constant 0 : index
    %c0_4 = arith.constant 0 : index
    %3 = vector.load %arg0[%c0_3, %c0_4] : memref<128x128xbf16, #tpu.memory_space<vmem>>, vector<128x128xbf16>
    %4 = arith.truncf %2 : vector<128x128xf32> to vector<128x128xbf16>
    %cst_5 = arith.constant dense<0.000000e+00> : vector<128x128xf32>
    %5 = tpu.matmul %3, %4, %cst_5 {dimension_numbers = #tpu.dot_dimension_numbers<[1], [0], [0], [1], [0, 0, 1, 1], [], []>} : vector<128x128xbf16>, vector<128x128xbf16>, vector<128x128xf32> -> vector<128x128xf32>
    %c0_6 = arith.constant 0 : index
    %c0_7 = arith.constant 0 : index
    %6 = vector.load %arg3[%c0_6, %c0_7] : memref<1x128xf32, #tpu.memory_space<vmem>>, vector<1x128xf32>
    %7 = vector.broadcast %6 : vector<1x128xf32> to vector<128x128xf32>
    %8 = arith.addf %5, %7 : vector<128x128xf32>
    %cst_8 = arith.constant 0.000000e+00 : f32
    %9 = vector.broadcast %cst_8 : f32 to vector<128x128xf32>
    %10 = arith.maximumf %8, %9 : vector<128x128xf32>
    %11 = arith.truncf %10 : vector<128x128xf32> to vector<128x128xbf16>
    %c0_9 = arith.constant 0 : index
    %c0_10 = arith.constant 0 : index
    %12 = vector.load %arg7[%c0_9, %c0_10] : memref<128x128xbf16, #tpu.memory_space<vmem>>, vector<128x128xbf16>
    tpu.vector_store %arg7[%c0_9, %c0_10], %11 {strides = array<i32>} : memref<128x128xbf16, #tpu.memory_space<vmem>>, vector<128x128xbf16>,
    %c0_11 = arith.constant 0 : index
    %c0_12 = arith.constant 0 : index
    %13 = vector.load %arg7[%c0_11, %c0_12] : memref<128x128xbf16, #tpu.memory_space<vmem>>, vector<128x128xbf16>
    %c0_13 = arith.constant 0 : index
    %c0_14 = arith.constant 0 : index
    %14 = vector.load %arg4[%c0_13, %c0_14] : memref<128x128xbf16, #tpu.memory_space<vmem>>, vector<128x128xbf16>
    %cst_15 = arith.constant dense<0.000000e+00> : vector<128x128xf32>
    %15 = tpu.matmul %13, %14, %cst_15 {dimension_numbers = #tpu.dot_dimension_numbers<[1], [0], [0], [1], [0, 0, 1, 1], [], []>} : vector<128x128xbf16>, vector<128x128xbf16>, vector<128x128xf32> -> vector<128x128xf32>
    %c0_16 = arith.constant 0 : index
    %c0_17 = arith.constant 0 : index
    %16 = vector.load %arg0[%c0_16, %c0_17] : memref<128x128xbf16, #tpu.memory_space<vmem>>, vector<128x128xbf16>
    %17 = arith.truncf %15 : vector<128x128xf32> to vector<128x128xbf16>
    %cst_18 = arith.constant dense<0.000000e+00> : vector<128x128xf32>
    %18 = tpu.matmul %16, %17, %cst_18 {dimension_numbers = #tpu.dot_dimension_numbers<[1], [0], [0], [1], [0, 0, 1, 1], [], []>} : vector<128x128xbf16>, vector<128x128xbf16>, vector<128x128xf32> -> vector<128x128xf32>
    %c0_19 = arith.constant 0 : index
    %c0_20 = arith.constant 0 : index
    %19 = vector.load %arg5[%c0_19, %c0_20] : memref<1x128xf32, #tpu.memory_space<vmem>>, vector<1x128xf32>
    %20 = vector.broadcast %19 : vector<1x128xf32> to vector<128x128xf32>
    %21 = arith.addf %18, %20 : vector<128x128xf32>
    %c0_21 = arith.constant 0 : index
    %c0_22 = arith.constant 0 : index
    %22 = vector.load %arg6[%c0_21, %c0_22] : memref<128x128xf32, #tpu.memory_space<vmem>>, vector<128x128xf32>
    tpu.vector_store %arg6[%c0_21, %c0_22], %21 {strides = array<i32>} : memref<128x128xf32, #tpu.memory_space<vmem>>, vector<128x128xf32>,
    return
  }
}

</mosaic_0001>

<bundles_post_ra>
// kernel: gnn_forward.1
= control target key start
LH: loop header
LB: loop body
LE: loop exit
PB: predicated region body
PF: predicated region fallthrough
CT: control target
= control target key end

     0   :  { %s1211_s2 = inlined_call_operand.vmem [shape: bf16[128,128], index: 2, kind: input, shape index: {}]   ;;  %s1212_s1 = inlined_call_operand.vmem [shape: bf16[128,128], index: 1, kind: input, shape index: {}]   ;;  %s1213_s3 = inlined_call_operand.vmem [shape: f32[1,128], index: 3, kind: input, shape index: {}]   ;;  %s1214_s0 = inlined_call_operand.vmem [shape: bf16[128,128], index: 0, kind: input, shape index: {}]   ;;  %s1215_s4 = inlined_call_operand.vmem [shape: bf16[128,128], index: 4, kind: input, shape index: {}]   ;;  %s1216_s5 = inlined_call_operand.vmem [shape: f32[1,128], index: 5, kind: input, shape index: {}]   ;;  %s1217_s6 = inlined_call_operand.vmem [shape: f32[128,128], index: 6, kind: output, shape index: {}]  }
   0x1   :  { %v902_v0 = vld [vmem:[%s1211_s2 + $0x38] sm:$0xff]  ;;  %v901_v1 = vld [vmem:[%s1211_s2 + $0x30] sm:$0xff]  ;;  %v900_v2 = vld [vmem:[%s1211_s2 + $0x28] sm:$0xff] }
   0x2   :  { %151 = vmatpush.bf16.msra.mxu0 %v902_v0  ;;  %v899_v3 = vld [vmem:[%s1211_s2 + $0x20] sm:$0xff]  ;;  %v898_v4 = vld [vmem:[%s1211_s2 + $0x18] sm:$0xff]  ;;  %v897_v5 = vld [vmem:[%s1211_s2 + $0x10] sm:$0xff] }
   0x3   :  { %v896_v6 = vld [vmem:[%s1211_s2 + $0x8] sm:$0xff]  ;;  %v895_v7 = vld [vmem:[%s1211_s2] sm:$0xff]  ;;  %v889_v10 = vld [vmem:[%s1212_s1 + $0x10] sm:$0xff] }
   0x4   :  { %v887_v8 = vld [vmem:[%s1212_s1] sm:$0xff]  ;;  %v888_v9 = vld [vmem:[%s1212_s1 + $0x8] sm:$0xff]  ;;  %v890_v11 = vld [vmem:[%s1212_s1 + $0x18] sm:$0xff] }
   0x5   :  { %v891_v12 = vld [vmem:[%s1212_s1 + $0x20] sm:$0xff]  ;;  %v892_v13 = vld [vmem:[%s1212_s1 + $0x28] sm:$0xff]  ;;  %v893_v14 = vld [vmem:[%s1212_s1 + $0x30] sm:$0xff] }
   0x6   :  { %152 = vmatpush.bf16.msra.mxu0 %v901_v1  ;;  %v894_v15 = vld [vmem:[%s1212_s1 + $0x38] sm:$0xff]  ;;  %v903_v40 = vld [vmem:[%s1214_s0] sm:$0xff]  ;;  %v904_v41 = vld [vmem:[%s1214_s0 + $0x8] sm:$0xff] }
   0x7   :  { %v905_v42 = vld [vmem:[%s1214_s0 + $0x10] sm:$0xff]  ;;  %v906_v43 = vld [vmem:[%s1214_s0 + $0x18] sm:$0xff]  ;;  %v907_v44 = vld [vmem:[%s1214_s0 + $0x20] sm:$0xff] }
   0x8   :  { %v908_v45 = vld [vmem:[%s1214_s0 + $0x28] sm:$0xff]  ;;  %v926_v46 = vld [vmem:[%s1215_s4 + $0x38] sm:$0xff]  ;;  %v925_v47 = vld [vmem:[%s1215_s4 + $0x30] sm:$0xff] }
   0x9   :  { %501 = vmatpush.bf16.msra.mxu2 %v926_v46  ;;  %v909_v48 = vld [vmem:[%s1214_s0 + $0x30] sm:$0xff]  ;;  %v924_v49 = vld [vmem:[%s1215_s4 + $0x28] sm:$0xff]  ;;  %v923_v50 = vld [vmem:[%s1215_s4 + $0x20] sm:$0xff] }
   0xa   :  { %153 = vmatpush.bf16.msra.mxu0 %v900_v2  ;;  %v922_v51 = vld [vmem:[%s1215_s4 + $0x18] sm:$0xff]  ;;  %v921_v52 = vld [vmem:[%s1215_s4 + $0x10] sm:$0xff]  ;;  %v920_v54 = vld [vmem:[%s1215_s4 + $0x8] sm:$0xff] }
   0xb   :  { %v910_v53 = vld [vmem:[%s1214_s0 + $0x38] sm:$0xff]  ;;  %v919_v55 = vld [vmem:[%s1215_s4] sm:$0xff] }
   0xc   :  { %v1118_v57 = vld [vmem:[%s1213_s3] ss:$0 sm:$0xff] }
   0xd   :  { %502 = vmatpush.bf16.msra.mxu2 %v925_v47 }
   0xe   :  { %154 = vmatpush.bf16.msra.mxu0 %v899_v3 }
  0x11   :  { %503 = vmatpush.bf16.msra.mxu2 %v924_v49 }
  0x12   :  { %155 = vmatpush.bf16.msra.mxu0 %v898_v4 }
  0x15   :  { %504 = vmatpush.bf16.msra.mxu2 %v923_v50 }
  0x16   :  { %156 = vmatpush.bf16.msra.mxu0 %v897_v5 }
  0x19   :  { %505 = vmatpush.bf16.msra.mxu2 %v922_v51 }
  0x1a   :  { %157 = vmatpush.bf16.msra.mxu0 %v896_v6 }
  0x1d   :  { %506 = vmatpush.bf16.msra.mxu2 %v921_v52 }
  0x1e   :  { %158 = vmatpush.bf16.msra.mxu0 %v895_v7 }
  0x21   :  { %159 = vmatmul.bf16.vlgmr.msra.gmra.mxu0 %v887_v8  ;;  %507 = vmatpush.bf16.msra.mxu2 %v920_v54 }
  0x25   :  { %508 = vmatpush.bf16.msra.mxu2 %v919_v55 }
  0x31   :  { %164 = vmatmul.bf16.gmra.mxu0 %v888_v9 }
  0x41   :  { %169 = vmatmul.bf16.gmra.mxu0 %v889_v10 }
  0x51   :  { %174 = vmatmul.bf16.gmra.mxu0 %v890_v11 }
  0x61   :  { %179 = vmatmul.bf16.gmra.mxu0 %v891_v12 }
  0x71   :  { %184 = vmatmul.bf16.gmra.mxu0 %v892_v13 }
  0x81   :  { %189 = vmatmul.bf16.gmra.mxu0 %v893_v14 }
  0x91   :  { %194 = vmatmul.bf16.gmra.mxu0 %v894_v15 }
  0x9e   :  { %v160_v16 = vpop.f32.mrf.mxu0 }
  0xa6   :  { %v162_v17 = vpop.f32.mrf.mxu0 }
  0xa7   :  { %v216_v18 = vpack.c.bf16 %v162_v17, %v160_v16 }
  0xae   :  { %v165_v19 = vpop.f32.mrf.mxu0 }
  0xb6   :  { %v167_v20 = vpop.f32.mrf.mxu0 }
  0xb7   :  { %v217_v21 = vpack.c.bf16 %v167_v20, %v165_v19 }
  0xbe   :  { %v170_v22 = vpop.f32.mrf.mxu0 }
  0xc6   :  { %v172_v23 = vpop.f32.mrf.mxu0 }
  0xc7   :  { %v218_v24 = vpack.c.bf16 %v172_v23, %v170_v22 }
  0xce   :  { %v175_v25 = vpop.f32.mrf.mxu0 }
  0xd6   :  { %v177_v26 = vpop.f32.mrf.mxu0 }
  0xd7   :  { %v219_v27 = vpack.c.bf16 %v177_v26, %v175_v25 }
  0xde   :  { %v180_v28 = vpop.f32.mrf.mxu0 }
  0xe6   :  { %v182_v29 = vpop.f32.mrf.mxu0 }
  0xe7   :  { %v220_v39 = vpack.c.bf16 %v182_v29, %v180_v28 }
  0xee   :  { %v185_v30 = vpop.f32.mrf.mxu0 }
  0xf6   :  { %v187_v31 = vpop.f32.mrf.mxu0 }
  0xf7   :  { %v221_v38 = vpack.c.bf16 %v187_v31, %v185_v30 }
  0xfe   :  { %v190_v32 = vpop.f32.mrf.mxu0 }
 0x106   :  { %v192_v33 = vpop.f32.mrf.mxu0 }
 0x107   :  { %v222_v37 = vpack.c.bf16 %v192_v33, %v190_v32 }
 0x10e   :  { %v195_v34 = vpop.f32.mrf.mxu0 }
 0x116   :  { %v197_v35 = vpop.f32.mrf.mxu0 }
 0x117   :  { %v223_v36 = vpack.c.bf16 %v197_v35, %v195_v34 }
 0x119   :  { %276 = vmatpush.bf16.msra.mxu1 %v223_v36 }
 0x11d   :  { %277 = vmatpush.bf16.msra.mxu1 %v222_v37 }
 0x121   :  { %278 = vmatpush.bf16.msra.mxu1 %v221_v38 }
 0x125   :  { %279 = vmatpush.bf16.msra.mxu1 %v220_v39 }
 0x129   :  { %280 = vmatpush.bf16.msra.mxu1 %v219_v27 }
 0x12d   :  { %281 = vmatpush.bf16.msra.mxu1 %v218_v24 }
 0x131   :  { %282 = vmatpush.bf16.msra.mxu1 %v217_v21 }
 0x135   :  { %283 = vmatpush.bf16.msra.mxu1 %v216_v18 }
 0x138   :  { %284 = vmatmul.bf16.vlgmr.msra.gmra.mxu1 %v903_v40 }
 0x148   :  { %289 = vmatmul.bf16.gmra.mxu1 %v904_v41 }
 0x158   :  { %294 = vmatmul.bf16.gmra.mxu1 %v905_v42 }
 0x168   :  { %299 = vmatmul.bf16.gmra.mxu1 %v906_v43 }
 0x178   :  { %304 = vmatmul.bf16.gmra.mxu1 %v907_v44 }
 0x188   :  { %309 = vmatmul.bf16.gmra.mxu1 %v908_v45 }
 0x198   :  { %314 = vmatmul.bf16.gmra.mxu1 %v909_v48 }
 0x1a8   :  { %319 = vmatmul.bf16.gmra.mxu1 %v910_v53 }
 0x1b5   :  { %v285_v56 = vpop.f32.mrf.mxu1 }
 0x1b6   :  { %v286_v58 = vadd.f32 %v1118_v57, %v285_v56 }
 0x1b8   :  { %v325_v61 = vmax.f32 %v286_v58, 0.0 }
 0x1bd   :  { %v287_v59 = vpop.f32.mrf.mxu1 }
 0x1be   :  { %v288_v60 = vadd.f32 %v1118_v57, %v287_v59 }
 0x1c0   :  { %v326_v62 = vmax.f32 %v288_v60, 0.0 }
 0x1c2   :  { %v938_v63 = vpack.c.bf16 %v326_v62, %v325_v61 }
 0x1c4   :  { %939 = vst [vmem:[#allocation2 + $0x30] sm:$0xff] %v938_v63  }
 0x1c5   :  { %v290_v0 = vpop.f32.mrf.mxu1 }
 0x1c6   :  { %v291_v2 = vadd.f32 %v1118_v57, %v290_v0 }
 0x1c8   :  { %v327_v5 = vmax.f32 %v291_v2, 0.0 }
 0x1cb   :  { %v911_v1 = vld [vmem:[#allocation2 + $0x30] sm:$0xff] }
 0x1cc   :  { %509 = vmatmul.bf16.vlgmr.msra.gmra.mxu2 %v911_v1 }
 0x1cd   :  { %v292_v3 = vpop.f32.mrf.mxu1 }
 0x1ce   :  { %v293_v4 = vadd.f32 %v1118_v57, %v292_v3 }
 0x1d0   :  { %v328_v6 = vmax.f32 %v293_v4, 0.0 }
 0x1d2   :  { %v943_v7 = vpack.c.bf16 %v328_v6, %v327_v5 }
 0x1d4   :  { %975 = vst [vmem:[#allocation2] sm:$0xff] %v943_v7  }
 0x1d5   :  { %v295_v8 = vpop.f32.mrf.mxu1 }
 0x1d6   :  { %v296_v10 = vadd.f32 %v1118_v57, %v295_v8 }
 0x1d8   :  { %v329_v13 = vmax.f32 %v296_v10, 0.0 }
 0x1db   :  { %v912_v9 = vld [vmem:[#allocation2] sm:$0xff] }
 0x1dc   :  { %514 = vmatmul.bf16.gmra.mxu2 %v912_v9 }
 0x1dd   :  { %v297_v11 = vpop.f32.mrf.mxu1 }
 0x1de   :  { %v298_v12 = vadd.f32 %v1118_v57, %v297_v11 }
 0x1e0   :  { %v330_v14 = vmax.f32 %v298_v12, 0.0 }
 0x1e2   :  { %v948_v15 = vpack.c.bf16 %v330_v14, %v329_v13 }
 0x1e4   :  { %976 = vst [vmem:[#allocation2 + $0x18] sm:$0xff] %v948_v15  }
 0x1e5   :  { %v300_v16 = vpop.f32.mrf.mxu1 }
 0x1e6   :  { %v301_v18 = vadd.f32 %v1118_v57, %v300_v16 }
 0x1e8   :  { %v331_v21 = vmax.f32 %v301_v18, 0.0  ;;  %v928_v18 = vld [vmem:[%s1214_s0 + $0x8] sm:$0xff] }
 0x1eb   :  { %v913_v17 = vld [vmem:[#allocation2 + $0x18] sm:$0xff] }
 0x1ec   :  { %519 = vmatmul.bf16.gmra.mxu2 %v913_v17  ;;  %v927_v17 = vld [vmem:[%s1214_s0] sm:$0xff] }
 0x1ed   :  { %v302_v19 = vpop.f32.mrf.mxu1 }
 0x1ee   :  { %v303_v20 = vadd.f32 %v1118_v57, %v302_v19  ;;  %v929_v19 = vld [vmem:[%s1214_s0 + $0x10] sm:$0xff] }
 0x1f0   :  { %v332_v22 = vmax.f32 %v303_v20, 0.0  ;;  %v930_v20 = vld [vmem:[%s1214_s0 + $0x18] sm:$0xff] }
 0x1f2   :  { %v953_v23 = vpack.c.bf16 %v332_v22, %v331_v21  ;;  %v931_v21 = vld [vmem:[%s1214_s0 + $0x20] sm:$0xff]  ;;  %v932_v22 = vld [vmem:[%s1214_s0 + $0x28] sm:$0xff] }
 0x1f4   :  { %977 = vst [vmem:[#allocation2 + $0x10] sm:$0xff] %v953_v23   ;;  %v933_v23 = vld [vmem:[%s1214_s0 + $0x30] sm:$0xff] }
 0x1f5   :  { %v305_v24 = vpop.f32.mrf.mxu1 }
 0x1f6   :  { %v306_v26 = vadd.f32 %v1118_v57, %v305_v24  ;;  %v934_v24 = vld [vmem:[%s1214_s0 + $0x38] sm:$0xff] }
 0x1f8   :  { %v333_v29 = vmax.f32 %v306_v26, 0.0 }
 0x1fb   :  { %v914_v25 = vld [vmem:[#allocation2 + $0x10] sm:$0xff] }
 0x1fc   :  { %524 = vmatmul.bf16.gmra.mxu2 %v914_v25  ;;  %v983_v25 = vld [vmem:[%s1216_s5] ss:$0 sm:$0xff] }
 0x1fd   :  { %v307_v27 = vpop.f32.mrf.mxu1 }
 0x1fe   :  { %v308_v28 = vadd.f32 %v1118_v57, %v307_v27 }
 0x200   :  { %v334_v30 = vmax.f32 %v308_v28, 0.0 }
 0x202   :  { %v958_v31 = vpack.c.bf16 %v334_v30, %v333_v29 }
 0x204   :  { %978 = vst [vmem:[#allocation2 + $0x8] sm:$0xff] %v958_v31  }
 0x205   :  { %v310_v32 = vpop.f32.mrf.mxu1 }
 0x206   :  { %v311_v34 = vadd.f32 %v1118_v57, %v310_v32 }
 0x208   :  { %v335_v37 = vmax.f32 %v311_v34, 0.0 }
 0x20b   :  { %v915_v33 = vld [vmem:[#allocation2 + $0x8] sm:$0xff] }
 0x20c   :  { %529 = vmatmul.bf16.gmra.mxu2 %v915_v33 }
 0x20d   :  { %v312_v35 = vpop.f32.mrf.mxu1 }
 0x20e   :  { %v313_v36 = vadd.f32 %v1118_v57, %v312_v35 }
 0x210   :  { %v336_v38 = vmax.f32 %v313_v36, 0.0 }
 0x212   :  { %v963_v39 = vpack.c.bf16 %v336_v38, %v335_v37 }
 0x214   :  { %979 = vst [vmem:[#allocation2 + $0x20] sm:$0xff] %v963_v39  }
 0x215   :  { %v315_v40 = vpop.f32.mrf.mxu1 }
 0x216   :  { %v316_v42 = vadd.f32 %v1118_v57, %v315_v40 }
 0x218   :  { %v337_v45 = vmax.f32 %v316_v42, 0.0 }
 0x21b   :  { %v916_v41 = vld [vmem:[#allocation2 + $0x20] sm:$0xff] }
 0x21c   :  { %534 = vmatmul.bf16.gmra.mxu2 %v916_v41 }
 0x21d   :  { %v317_v43 = vpop.f32.mrf.mxu1 }
 0x21e   :  { %v318_v44 = vadd.f32 %v1118_v57, %v317_v43 }
 0x220   :  { %v338_v46 = vmax.f32 %v318_v44, 0.0 }
 0x222   :  { %v968_v47 = vpack.c.bf16 %v338_v46, %v337_v45 }
 0x224   :  { %980 = vst [vmem:[#allocation2 + $0x28] sm:$0xff] %v968_v47  }
 0x225   :  { %v320_v48 = vpop.f32.mrf.mxu1 }
 0x226   :  { %v321_v50 = vadd.f32 %v1118_v57, %v320_v48 }
 0x228   :  { %v339_v53 = vmax.f32 %v321_v50, 0.0 }
 0x22b   :  { %v917_v49 = vld [vmem:[#allocation2 + $0x28] sm:$0xff] }
 0x22c   :  { %539 = vmatmul.bf16.gmra.mxu2 %v917_v49 }
 0x22d   :  { %v322_v51 = vpop.f32.mrf.mxu1 }
 0x22e   :  { %v323_v52 = vadd.f32 %v1118_v57, %v322_v51 }
 0x230   :  { %v340_v54 = vmax.f32 %v323_v52, 0.0 }
 0x232   :  { %v973_v55 = vpack.c.bf16 %v340_v54, %v339_v53 }
 0x234   :  { %981 = vst [vmem:[#allocation2 + $0x38] sm:$0xff] %v973_v55  }
 0x23b   :  { %v918_v56 = vld [vmem:[#allocation2 + $0x38] sm:$0xff] }
 0x23c   :  { %544 = vmatmul.bf16.gmra.mxu2 %v918_v56 }
 0x24f   :  { %v510_v58 = vpop.f32.mrf.mxu2 }
 0x257   :  { %v512_v59 = vpop.f32.mrf.mxu2 }
 0x258   :  { %v566_v60 = vpack.c.bf16 %v512_v59, %v510_v58 }
 0x25f   :  { %v515_v61 = vpop.f32.mrf.mxu2 }
 0x267   :  { %v517_v62 = vpop.f32.mrf.mxu2 }
 0x268   :  { %v567_v63 = vpack.c.bf16 %v517_v62, %v515_v61 }
 0x26f   :  { %v520_v0 = vpop.f32.mrf.mxu2 }
 0x277   :  { %v522_v1 = vpop.f32.mrf.mxu2 }
 0x278   :  { %v568_v2 = vpack.c.bf16 %v522_v1, %v520_v0 }
 0x27f   :  { %v525_v3 = vpop.f32.mrf.mxu2 }
 0x287   :  { %v527_v4 = vpop.f32.mrf.mxu2 }
 0x288   :  { %v569_v5 = vpack.c.bf16 %v527_v4, %v525_v3 }
 0x28f   :  { %v530_v6 = vpop.f32.mrf.mxu2 }
 0x297   :  { %v532_v57 = vpop.f32.mrf.mxu2 }
 0x298   :  { %v570_v16 = vpack.c.bf16 %v532_v57, %v530_v6 }
 0x29f   :  { %v535_v7 = vpop.f32.mrf.mxu2 }
 0x2a7   :  { %v537_v8 = vpop.f32.mrf.mxu2 }
 0x2a8   :  { %v571_v15 = vpack.c.bf16 %v537_v8, %v535_v7 }
 0x2af   :  { %v540_v9 = vpop.f32.mrf.mxu2 }
 0x2b7   :  { %v542_v10 = vpop.f32.mrf.mxu2 }
 0x2b8   :  { %v572_v14 = vpack.c.bf16 %v542_v10, %v540_v9 }
 0x2bf   :  { %v545_v11 = vpop.f32.mrf.mxu2 }
 0x2c7   :  { %v547_v12 = vpop.f32.mrf.mxu2 }
 0x2c8   :  { %v573_v13 = vpack.c.bf16 %v547_v12, %v545_v11 }
 0x2ca   :  { %626 = vmatpush.bf16.msra.mxu3 %v573_v13 }
 0x2ce   :  { %627 = vmatpush.bf16.msra.mxu3 %v572_v14 }
 0x2d2   :  { %628 = vmatpush.bf16.msra.mxu3 %v571_v15 }
 0x2d6   :  { %629 = vmatpush.bf16.msra.mxu3 %v570_v16 }
 0x2da   :  { %630 = vmatpush.bf16.msra.mxu3 %v569_v5 }
 0x2de   :  { %631 = vmatpush.bf16.msra.mxu3 %v568_v2 }
 0x2e2   :  { %632 = vmatpush.bf16.msra.mxu3 %v567_v63 }
 0x2e6   :  { %633 = vmatpush.bf16.msra.mxu3 %v566_v60 }
 0x2e9   :  { %634 = vmatmul.bf16.vlgmr.msra.gmra.mxu3 %v927_v17 }
 0x2f9   :  { %639 = vmatmul.bf16.gmra.mxu3 %v928_v18 }
 0x309   :  { %644 = vmatmul.bf16.gmra.mxu3 %v929_v19 }
 0x319   :  { %649 = vmatmul.bf16.gmra.mxu3 %v930_v20 }
 0x329   :  { %654 = vmatmul.bf16.gmra.mxu3 %v931_v21 }
 0x339   :  { %659 = vmatmul.bf16.gmra.mxu3 %v932_v22 }
 0x349   :  { %664 = vmatmul.bf16.gmra.mxu3 %v933_v23 }
 0x359   :  { %669 = vmatmul.bf16.gmra.mxu3 %v934_v24 }
 0x36c   :  { %v635_v26 = vpop.f32.mrf.mxu3 }
 0x36d   :  { %v636_v27 = vadd.f32 %v983_v25, %v635_v26 }
 0x36f   :  { %675 = vst [vmem:[%s1217_s6] sm:$0xff] %v636_v27 }
 0x374   :  { %v637_v28 = vpop.f32.mrf.mxu3 }
 0x375   :  { %v638_v29 = vadd.f32 %v983_v25, %v637_v28 }
 0x377   :  { %676 = vst [vmem:[%s1217_s6 + $0x8] sm:$0xff] %v638_v29 }
 0x37c   :  { %v640_v30 = vpop.f32.mrf.mxu3 }
 0x37d   :  { %v641_v31 = vadd.f32 %v983_v25, %v640_v30 }
 0x37f   :  { %677 = vst [vmem:[%s1217_s6 + $0x10] sm:$0xff] %v641_v31 }
 0x384   :  { %v642_v32 = vpop.f32.mrf.mxu3 }
 0x385   :  { %v643_v33 = vadd.f32 %v983_v25, %v642_v32 }
 0x387   :  { %678 = vst [vmem:[%s1217_s6 + $0x18] sm:$0xff] %v643_v33 }
 0x38c   :  { %v645_v34 = vpop.f32.mrf.mxu3 }
 0x38d   :  { %v646_v35 = vadd.f32 %v983_v25, %v645_v34 }
 0x38f   :  { %679 = vst [vmem:[%s1217_s6 + $0x20] sm:$0xff] %v646_v35 }
 0x394   :  { %v647_v36 = vpop.f32.mrf.mxu3 }
 0x395   :  { %v648_v37 = vadd.f32 %v983_v25, %v647_v36 }
 0x397   :  { %680 = vst [vmem:[%s1217_s6 + $0x28] sm:$0xff] %v648_v37 }
 0x39c   :  { %v650_v38 = vpop.f32.mrf.mxu3 }
 0x39d   :  { %v651_v39 = vadd.f32 %v983_v25, %v650_v38 }
 0x39f   :  { %681 = vst [vmem:[%s1217_s6 + $0x30] sm:$0xff] %v651_v39 }
 0x3a4   :  { %v652_v40 = vpop.f32.mrf.mxu3 }
 0x3a5   :  { %v653_v41 = vadd.f32 %v983_v25, %v652_v40 }
 0x3a7   :  { %682 = vst [vmem:[%s1217_s6 + $0x38] sm:$0xff] %v653_v41 }
 0x3ac   :  { %v655_v42 = vpop.f32.mrf.mxu3 }
 0x3ad   :  { %v656_v43 = vadd.f32 %v983_v25, %v655_v42 }
 0x3af   :  { %683 = vst [vmem:[%s1217_s6 + $0x40] sm:$0xff] %v656_v43 }
 0x3b4   :  { %v657_v44 = vpop.f32.mrf.mxu3 }
 0x3b5   :  { %v658_v45 = vadd.f32 %v983_v25, %v657_v44 }
 0x3b7   :  { %684 = vst [vmem:[%s1217_s6 + $0x48] sm:$0xff] %v658_v45 }
 0x3bc   :  { %v660_v46 = vpop.f32.mrf.mxu3 }
 0x3bd   :  { %v661_v47 = vadd.f32 %v983_v25, %v660_v46 }
 0x3bf   :  { %685 = vst [vmem:[%s1217_s6 + $0x50] sm:$0xff] %v661_v47 }
 0x3c4   :  { %v662_v48 = vpop.f32.mrf.mxu3 }
 0x3c5   :  { %v663_v49 = vadd.f32 %v983_v25, %v662_v48 }
 0x3c7   :  { %686 = vst [vmem:[%s1217_s6 + $0x58] sm:$0xff] %v663_v49 }
 0x3cc   :  { %v665_v50 = vpop.f32.mrf.mxu3 }
 0x3cd   :  { %v666_v51 = vadd.f32 %v983_v25, %v665_v50 }
 0x3cf   :  { %687 = vst [vmem:[%s1217_s6 + $0x60] sm:$0xff] %v666_v51 }
 0x3d4   :  { %v667_v52 = vpop.f32.mrf.mxu3 }
 0x3d5   :  { %v668_v53 = vadd.f32 %v983_v25, %v667_v52 }
 0x3d7   :  { %688 = vst [vmem:[%s1217_s6 + $0x68] sm:$0xff] %v668_v53 }
 0x3dc   :  { %v670_v54 = vpop.f32.mrf.mxu3 }
 0x3dd   :  { %v671_v55 = vadd.f32 %v983_v25, %v670_v54 }
 0x3df   :  { %689 = vst [vmem:[%s1217_s6 + $0x70] sm:$0xff] %v671_v55 }
 0x3e4   :  { %v672_v56 = vpop.f32.mrf.mxu3 }
 0x3e5   :  { %v673_v58 = vadd.f32 %v983_v25, %v672_v56 }
 0x3e7   :  { %690 = vst [vmem:[%s1217_s6 + $0x78] sm:$0xff] %v673_v58 }

</bundles_post_ra>
